<compile_context>
chip_gen: v7x
topology: tpu7x:2x2x1
jax: 0.10.0
libtpu: 0.0.40
codegen_flags: <defaults>
</compile_context>

<pallas_src>
import functools
import math

import jax
import jax.numpy as jnp
from jax.experimental import pallas as pl
from jax.experimental.pallas import tpu as pltpu


# --------------------------------------------------------------------------
# Kernel
# --------------------------------------------------------------------------
def _lif_kernel(x_ref, v_in, i_in, rc_in, tr_in, sm_in,
                v_out, i_out, rc_out, tr_out, sm_out, s_out,
                *, decay, i_decay, rest, reset, thresh, refrac, dt,
                lbound, trace_decay, trace_scale, traces_additive):
    """One LIF time step on one row block.  State is carried in the output
    refs, which are resident in VMEM across the t grid axis."""
    t = pl.program_id(1)

    # Load the initial state into the resident output blocks at t == 0.
    @pl.when(t == 0)
    def _():
        v_out[...] = v_in[...]
        i_out[...] = i_in[...]
        rc_out[...] = rc_in[...]
        tr_out[...] = tr_in[...]
        sm_out[...] = sm_in[...]

    x = x_ref[0]                                   # (block_rows, lanes) f32

    # v = decay * (v - rest) + rest
    v = decay * (v_out[...] - rest) + rest
    # i *= i_decay ; i += x
    cur = i_out[...] * i_decay + x
    # refrac_count -= dt
    rc = rc_out[...] - dt
    # v += (refrac_count <= 0).float() * i
    v = v + jnp.where(rc <= 0.0, cur, jnp.float32(0.0))
    # s = v >= thresh
    s = v >= thresh
    # refrac_count.masked_fill_(s, refrac) ; v.masked_fill_(s, reset)
    rc = jnp.where(s, jnp.float32(refrac), rc)
    v = jnp.where(s, jnp.float32(reset), v)
    # v.masked_fill_(v < lbound, lbound)  ==  max(v, lbound)
    if lbound is not None:
        v = jnp.maximum(v, jnp.float32(lbound))

    # Nodes.forward(): spike trace + summed input
    tr = tr_out[...] * trace_decay
    if traces_additive:
        tr = tr + trace_scale * s.astype(jnp.float32)
    else:
        tr = jnp.where(s, jnp.float32(trace_scale), tr)
    sm = sm_out[...] + x

    v_out[...] = v
    i_out[...] = cur
    rc_out[...] = rc
    tr_out[...] = tr
    sm_out[...] = sm
    s_out[0] = s.astype(s_out.dtype)               # bf16 0/1, lane-dense stores


# --------------------------------------------------------------------------
# Layout / sizing
# --------------------------------------------------------------------------
_LANES = 512                       # lane-dense width (multiple of 128)


def _round_up(a, b):
    return -(-a // b) * b


def _budgets():
    """Per-generation VMEM budget and target block size (bytes of f32)."""
    cap = None
    try:
        info = pltpu.get_tpu_info()
        for name in ("vmem_capacity_bytes", "vmem_bytes", "vmem_size_bytes"):
            c = getattr(info, name, None)
            if c:
                cap = int(c)
                break
    except Exception:
        cap = None
    if cap is None:
        cap = 128 * 1024 * 1024                    # v5e/v6e physical
    # Leave headroom: v7x (64 MiB physical) -> 32 MiB, v5e/v6e -> 48 MiB.
    vmem_limit = int(min(48 * 2**20, max(16 * 2**20, cap // 2)))
    # ~24 live double-buffered stream blocks (6 in + 6 out); keep margin.
    target_block_bytes = int(max(256 * 1024, vmem_limit // 32))
    return target_block_bytes, vmem_limit


def _layout(total):
    """Pad the flattened element count to a lane-dense (rows, _LANES) slab with
    rows a multiple of a 16-aligned block_rows.  Always big, aligned blocks."""
    target_block_bytes, vmem_limit = _budgets()
    lanes = _LANES
    rows_needed = -(-total // lanes)
    target_rows = max(16, (target_block_bytes // (4 * lanes)) // 16 * 16)
    if rows_needed <= target_rows:
        block_rows = _round_up(rows_needed, 16)
        rows = block_rows
    else:
        block_rows = target_rows
        rows = _round_up(rows_needed, block_rows)
    return rows, lanes, block_rows, vmem_limit


# --------------------------------------------------------------------------
# Wrappers
# --------------------------------------------------------------------------
def current_lif_simulate(xs, v, i, refrac_count, trace, summed, *,
                         decay, i_decay, rest, reset, thresh, refrac, dt,
                         lbound, trace_decay, trace_scale,
                         traces_additive=False):
    """Run T fused CurrentLIFNodes steps.

    xs: (T, *state_shape) float inputs; state tensors: (*state_shape) float32.
    Returns (v, i, refrac_count, spikes_bf16[(T, *state_shape)], trace, summed).
    Spikes are bfloat16 0/1 (cast to bool downstream only if needed).
    """
    state_shape = v.shape
    T = int(xs.shape[0])
    total = int(v.size)
    rows, lanes, block_rows, vmem_limit = _layout(total)
    padded_total = rows * lanes
    pad = padded_total - total

    def flat_state(a):
        a = a.reshape(total).astype(jnp.float32)
        if pad:
            a = jnp.pad(a, (0, pad))
        return a.reshape(rows, lanes)

    x2 = xs.reshape(T, total).astype(jnp.float32)
    if pad:
        x2 = jnp.pad(x2, ((0, 0), (0, pad)))
    x3 = x2.reshape(T, rows, lanes)

    v2, i2, rc2, tr2, sm2 = map(flat_state, (v, i, refrac_count, trace, summed))

    kernel = functools.partial(
        _lif_kernel,
        decay=float(decay), i_decay=float(i_decay), rest=float(rest),
        reset=float(reset), thresh=float(thresh), refrac=float(refrac),
        dt=float(dt), lbound=(None if lbound is None else float(lbound)),
        trace_decay=float(trace_decay), trace_scale=float(trace_scale),
        traces_additive=traces_additive)

    # State blocks: resident across the t axis (index_map ignores t).
    state_spec = pl.BlockSpec((block_rows, lanes), lambda r, t: (r, 0))
    # Streaming blocks: one time step of x in / spikes out per grid step.
    stream_spec = pl.BlockSpec((1, block_rows, lanes), lambda r, t: (t, r, 0))

    state_sds = jax.ShapeDtypeStruct((rows, lanes), jnp.float32)
    spikes_sds = jax.ShapeDtypeStruct((T, rows, lanes), jnp.bfloat16)

    outs = pl.pallas_call(
        kernel,
        out_shape=(state_sds,) * 5 + (spikes_sds,),
        grid_spec=pltpu.PrefetchScalarGridSpec(
            num_scalar_prefetch=0,
            grid=(rows // block_rows, T),
            in_specs=[stream_spec] + [state_spec] * 5,
            out_specs=[state_spec] * 5 + [stream_spec],
        ),
        # In-place state update: v, i, refrac_count, trace, summed.
        # (input idx -> output idx; outputs are (v, i, rc, tr, sm, s)).
        # Callers should donate the state buffers under jit for this to stick.
        input_output_aliases={1: 0, 2: 1, 3: 2, 4: 3, 5: 4},
        compiler_params=pltpu.CompilerParams(
            dimension_semantics=("parallel", "arbitrary"),
            vmem_limit_bytes=vmem_limit),
        cost_estimate=pl.CostEstimate(
            flops=12 * padded_total * T,
            transcendentals=0,
            bytes_accessed=6 * padded_total * T + 40 * padded_total),
    )(x3, v2, i2, rc2, tr2, sm2)

    v_n, i_n, rc_n, tr_n, sm_n, s_n = outs

    def unflat_state(a):
        return a.reshape(padded_total)[:total].reshape(state_shape)

    s_out = s_n.reshape(T, padded_total)[:, :total].reshape((T,) + state_shape)
    return (unflat_state(v_n), unflat_state(i_n), unflat_state(rc_n),
            s_out, unflat_state(tr_n), unflat_state(sm_n))


def current_lif_forward(x, v, i, refrac_count, trace, summed, **kwargs):
    """Single CurrentLIFNodes.forward() step (fused kernel with T=1)."""
    v_n, i_n, rc_n, s_n, tr_n, sm_n = current_lif_simulate(
        x[None], v, i, refrac_count, trace, summed, **kwargs)
    return v_n, i_n, rc_n, s_n[0], tr_n, sm_n


# --------------------------------------------------------------------------
# Pure-JAX reference (mirrors the PyTorch forward exactly)
# --------------------------------------------------------------------------
def _reference_step(x, v, i, rc, tr, sm, *, decay, i_decay, rest, reset,
                    thresh, refrac, dt, lbound, trace_decay, trace_scale):
    v = decay * (v - rest) + rest
    i = i * i_decay
    rc = rc - dt
    i = i + x
    v = v + (rc <= 0.0).astype(jnp.float32) * i
    s = v >= thresh
    rc = jnp.where(s, refrac, rc)
    v = jnp.where(s, reset, v)
    if lbound is not None:
        v = jnp.where(v < lbound, lbound, v)
    tr = tr * trace_decay
    tr = jnp.where(s, trace_scale, tr)
    sm = sm + x
    return v, i, rc, s, tr, sm


def _reference_simulate(xs, v, i, rc, tr, sm, **params):
    spikes = []
    for t in range(xs.shape[0]):
        v, i, rc, s, tr, sm = _reference_step(xs[t], v, i, rc, tr, sm, **params)
        spikes.append(s)
    return v, i, rc, jnp.stack(spikes), tr, sm


# --------------------------------------------------------------------------
# Demo / self-test
# --------------------------------------------------------------------------
if __name__ == "__main__":
    # Module config / derived decays (compute_decays(dt=1.0))
    dt = 1.0
    thresh, rest, reset, refrac = -52.0, -65.0, -65.0, 5.0
    tc_decay, tc_i_decay, tc_trace = 100.0, 2.0, 20.0
    trace_scale, lbound = 1.0, -70.0
    decay = math.exp(-dt / tc_decay)
    i_decay = math.exp(-dt / tc_i_decay)
    trace_decay = math.exp(-dt / tc_trace)

    # Small NCHW-like layer: T=8 steps, batch=2, shape=(4, 16, 16) -> n = 1024
    T, B, C, H, W = 8, 2, 4, 16, 16

    key = jax.random.PRNGKey(0)
    kx, kv, ki, kr = jax.random.split(key, 4)
    xs = jax.random.uniform(kx, (T, B, C, H, W), jnp.float32, 0.0, 30.0)
    v0 = rest + jax.random.uniform(kv, (B, C, H, W), jnp.float32, -2.0, 2.0)
    i0 = jax.random.uniform(ki, (B, C, H, W), jnp.float32, 0.0, 2.0)
    rc0 = jnp.where(jax.random.uniform(kr, (B, C, H, W)) < 0.1, 3.0, 0.0
                    ).astype(jnp.float32)
    tr0 = jnp.zeros((B, C, H, W), jnp.float32)
    sm0 = jnp.zeros((B, C, H, W), jnp.float32)

    params = dict(decay=decay, i_decay=i_decay, rest=rest, reset=reset,
                  thresh=thresh, refrac=refrac, dt=dt, lbound=lbound,
                  trace_decay=trace_decay, trace_scale=trace_scale)

    # ---- fused T-step simulation -----------------------------------------
    ref = _reference_simulate(xs, v0, i0, rc0, tr0, sm0, **params)
    out = current_lif_simulate(xs, v0, i0, rc0, tr0, sm0, **params)
    out = jax.block_until_ready(out)

    v_k, i_k, rc_k, s_k, tr_k, sm_k = out
    v_r, i_r, rc_r, s_r, tr_r, sm_r = ref
    assert jnp.allclose(v_k, v_r, atol=1e-4)
    assert jnp.allclose(i_k, i_r, atol=1e-4)
    assert jnp.allclose(rc_k, rc_r, atol=1e-4)
    assert jnp.array_equal(s_k > 0, s_r)           # spikes carried as bf16 0/1
    assert jnp.allclose(tr_k, tr_r, atol=1e-4)
    assert jnp.allclose(sm_k, sm_r, atol=1e-4)

    # ---- single step (module.forward semantics, T = 1) --------------------
    ref1 = _reference_step(xs[0], v0, i0, rc0, tr0, sm0, **params)
    out1 = current_lif_forward(xs[0], v0, i0, rc0, tr0, sm0, **params)
    out1 = jax.block_until_ready(out1)
    v1, i1, rc1, s1, tr1, sm1 = out1
    v1r, i1r, rc1r, s1r, tr1r, sm1r = ref1
    assert jnp.allclose(v1, v1r, atol=1e-5)
    assert jnp.allclose(i1, i1r, atol=1e-5)
    assert jnp.allclose(rc1, rc1r, atol=1e-5)
    assert jnp.array_equal(s1 > 0, s1r)
    assert jnp.allclose(tr1, tr1r, atol=1e-5)
    assert jnp.allclose(sm1, sm1r, atol=1e-5)

    print("KERNEL_OK")
</pallas_src>

<mosaic_0001>
module attributes {stable_mosaic.version = 11 : i64} {
  func.func @_lif_kernel(%arg0: i32, %arg1: i32, %arg2: memref<1x16x512xf32, #tpu.memory_space<vmem>>, %arg3: memref<16x512xf32, #tpu.memory_space<vmem>>, %arg4: memref<16x512xf32, #tpu.memory_space<vmem>>, %arg5: memref<16x512xf32, #tpu.memory_space<vmem>>, %arg6: memref<16x512xf32, #tpu.memory_space<vmem>>, %arg7: memref<16x512xf32, #tpu.memory_space<vmem>>, %arg8: memref<16x512xf32, #tpu.memory_space<vmem>>, %arg9: memref<16x512xf32, #tpu.memory_space<vmem>>, %arg10: memref<16x512xf32, #tpu.memory_space<vmem>>, %arg11: memref<16x512xf32, #tpu.memory_space<vmem>>, %arg12: memref<16x512xf32, #tpu.memory_space<vmem>>, %arg13: memref<1x16x512xbf16, #tpu.memory_space<vmem>>) attributes {dimension_semantics = [#tpu.dimension_semantics<parallel>, #tpu.dimension_semantics<arbitrary>], iteration_bounds = array<i64: 1, 8>, scalar_prefetch = 0 : i64, scratch_operands = 0 : i64, tpu.core_type = #tpu.core_type<tc>, window_params = [{transform_indices = @transform_0, window_bounds = array<i64: 1, 16, 512>}, {transform_indices = @transform_1, window_bounds = array<i64: 16, 512>}, {transform_indices = @transform_2, window_bounds = array<i64: 16, 512>}, {transform_indices = @transform_3, window_bounds = array<i64: 16, 512>}, {transform_indices = @transform_4, window_bounds = array<i64: 16, 512>}, {transform_indices = @transform_5, window_bounds = array<i64: 16, 512>}, {transform_indices = @transform_6, window_bounds = array<i64: 16, 512>}, {transform_indices = @transform_7, window_bounds = array<i64: 16, 512>}, {transform_indices = @transform_8, window_bounds = array<i64: 16, 512>}, {transform_indices = @transform_9, window_bounds = array<i64: 16, 512>}, {transform_indices = @transform_10, window_bounds = array<i64: 16, 512>}, {transform_indices = @transform_11, window_bounds = array<i64: 1, 16, 512>}]} {
    %c0_i32 = arith.constant 0 : i32
    %0 = arith.cmpi eq, %arg1, %c0_i32 : i32
    %1 = arith.extui %0 : i1 to i32
    %c0_i32_0 = arith.constant 0 : i32
    %2 = arith.cmpi ne, %1, %c0_i32_0 : i32
    scf.if %2 {
      %c0_38 = arith.constant 0 : index
      %c0_39 = arith.constant 0 : index
      %50 = vector.load %arg3[%c0_38, %c0_39] : memref<16x512xf32, #tpu.memory_space<vmem>>, vector<16x512xf32>
      %c0_40 = arith.constant 0 : index
      %c0_41 = arith.constant 0 : index
      %51 = vector.load %arg8[%c0_40, %c0_41] : memref<16x512xf32, #tpu.memory_space<vmem>>, vector<16x512xf32>
      tpu.vector_store %arg8[%c0_40, %c0_41], %50 {strides = array<i32>} : memref<16x512xf32, #tpu.memory_space<vmem>>, vector<16x512xf32>,
      %c0_42 = arith.constant 0 : index
      %c0_43 = arith.constant 0 : index
      %52 = vector.load %arg4[%c0_42, %c0_43] : memref<16x512xf32, #tpu.memory_space<vmem>>, vector<16x512xf32>
      %c0_44 = arith.constant 0 : index
      %c0_45 = arith.constant 0 : index
      %53 = vector.load %arg9[%c0_44, %c0_45] : memref<16x512xf32, #tpu.memory_space<vmem>>, vector<16x512xf32>
      tpu.vector_store %arg9[%c0_44, %c0_45], %52 {strides = array<i32>} : memref<16x512xf32, #tpu.memory_space<vmem>>, vector<16x512xf32>,
      %c0_46 = arith.constant 0 : index
      %c0_47 = arith.constant 0 : index
      %54 = vector.load %arg5[%c0_46, %c0_47] : memref<16x512xf32, #tpu.memory_space<vmem>>, vector<16x512xf32>
      %c0_48 = arith.constant 0 : index
      %c0_49 = arith.constant 0 : index
      %55 = vector.load %arg10[%c0_48, %c0_49] : memref<16x512xf32, #tpu.memory_space<vmem>>, vector<16x512xf32>
      tpu.vector_store %arg10[%c0_48, %c0_49], %54 {strides = array<i32>} : memref<16x512xf32, #tpu.memory_space<vmem>>, vector<16x512xf32>,
      %c0_50 = arith.constant 0 : index
      %c0_51 = arith.constant 0 : index
      %56 = vector.load %arg6[%c0_50, %c0_51] : memref<16x512xf32, #tpu.memory_space<vmem>>, vector<16x512xf32>
      %c0_52 = arith.constant 0 : index
      %c0_53 = arith.constant 0 : index
      %57 = vector.load %arg11[%c0_52, %c0_53] : memref<16x512xf32, #tpu.memory_space<vmem>>, vector<16x512xf32>
      tpu.vector_store %arg11[%c0_52, %c0_53], %56 {strides = array<i32>} : memref<16x512xf32, #tpu.memory_space<vmem>>, vector<16x512xf32>,
      %c0_54 = arith.constant 0 : index
      %c0_55 = arith.constant 0 : index
      %58 = vector.load %arg7[%c0_54, %c0_55] : memref<16x512xf32, #tpu.memory_space<vmem>>, vector<16x512xf32>
      %c0_56 = arith.constant 0 : index
      %c0_57 = arith.constant 0 : index
      %59 = vector.load %arg12[%c0_56, %c0_57] : memref<16x512xf32, #tpu.memory_space<vmem>>, vector<16x512xf32>
      tpu.vector_store %arg12[%c0_56, %c0_57], %58 {strides = array<i32>} : memref<16x512xf32, #tpu.memory_space<vmem>>, vector<16x512xf32>,
    } else {
    }
    %c0 = arith.constant 0 : index
    %c0_1 = arith.constant 0 : index
    %c0_2 = arith.constant 0 : index
    %3 = vector.load %arg2[%c0, %c0_1, %c0_2] : memref<1x16x512xf32, #tpu.memory_space<vmem>>, vector<1x16x512xf32>
    %4 = vector.shape_cast %3 : vector<1x16x512xf32> to vector<16x512xf32>
    %c0_3 = arith.constant 0 : index
    %c0_4 = arith.constant 0 : index
    %5 = vector.load %arg8[%c0_3, %c0_4] : memref<16x512xf32, #tpu.memory_space<vmem>>, vector<16x512xf32>
    %cst = arith.constant -6.500000e+01 : f32
    %6 = vector.broadcast %cst : f32 to vector<16x512xf32>
    %7 = arith.subf %5, %6 : vector<16x512xf32>
    %cst_5 = arith.constant 0.990049839 : f32
    %8 = vector.broadcast %cst_5 : f32 to vector<16x512xf32>
    %9 = arith.mulf %8, %7 : vector<16x512xf32>
    %cst_6 = arith.constant -6.500000e+01 : f32
    %10 = vector.broadcast %cst_6 : f32 to vector<16x512xf32>
    %11 = arith.addf %9, %10 : vector<16x512xf32>
    %c0_7 = arith.constant 0 : index
    %c0_8 = arith.constant 0 : index
    %12 = vector.load %arg9[%c0_7, %c0_8] : memref<16x512xf32, #tpu.memory_space<vmem>>, vector<16x512xf32>
    %cst_9 = arith.constant 0.606530666 : f32
    %13 = vector.broadcast %cst_9 : f32 to vector<16x512xf32>
    %14 = arith.mulf %12, %13 : vector<16x512xf32>
    %15 = arith.addf %14, %4 : vector<16x512xf32>
    %c0_10 = arith.constant 0 : index
    %c0_11 = arith.constant 0 : index
    %16 = vector.load %arg10[%c0_10, %c0_11] : memref<16x512xf32, #tpu.memory_space<vmem>>, vector<16x512xf32>
    %cst_12 = arith.constant 1.000000e+00 : f32
    %17 = vector.broadcast %cst_12 : f32 to vector<16x512xf32>
    %18 = arith.subf %16, %17 : vector<16x512xf32>
    %cst_13 = arith.constant 0.000000e+00 : f32
    %19 = vector.broadcast %cst_13 : f32 to vector<16x512xf32>
    %20 = arith.cmpf ole, %18, %19 : vector<16x512xf32>
    %cst_14 = arith.constant 0.000000e+00 : f32
    %21 = vector.broadcast %cst_14 : f32 to vector<16x512xf32>
    %22 = arith.select %20, %15, %21 : vector<16x512xi1>, vector<16x512xf32>
    %23 = arith.addf %11, %22 : vector<16x512xf32>
    %cst_15 = arith.constant -5.200000e+01 : f32
    %24 = vector.broadcast %cst_15 : f32 to vector<16x512xf32>
    %25 = arith.cmpf oge, %23, %24 : vector<16x512xf32>
    %cst_16 = arith.constant 5.000000e+00 : f32
    %26 = vector.broadcast %cst_16 : f32 to vector<16x512xf32>
    %27 = arith.select %25, %26, %18 : vector<16x512xi1>, vector<16x512xf32>
    %cst_17 = arith.constant -6.500000e+01 : f32
    %28 = vector.broadcast %cst_17 : f32 to vector<16x512xf32>
    %29 = arith.select %25, %28, %23 : vector<16x512xi1>, vector<16x512xf32>
    %cst_18 = arith.constant -7.000000e+01 : f32
    %30 = vector.broadcast %cst_18 : f32 to vector<16x512xf32>
    %31 = arith.maximumf %29, %30 : vector<16x512xf32>
    %c0_19 = arith.constant 0 : index
    %c0_20 = arith.constant 0 : index
    %32 = vector.load %arg11[%c0_19, %c0_20] : memref<16x512xf32, #tpu.memory_space<vmem>>, vector<16x512xf32>
    %cst_21 = arith.constant 0.951229453 : f32
    %33 = vector.broadcast %cst_21 : f32 to vector<16x512xf32>
    %34 = arith.mulf %32, %33 : vector<16x512xf32>
    %cst_22 = arith.constant 1.000000e+00 : f32
    %35 = vector.broadcast %cst_22 : f32 to vector<16x512xf32>
    %36 = arith.select %25, %35, %34 : vector<16x512xi1>, vector<16x512xf32>
    %c0_23 = arith.constant 0 : index
    %c0_24 = arith.constant 0 : index
    %37 = vector.load %arg12[%c0_23, %c0_24] : memref<16x512xf32, #tpu.memory_space<vmem>>, vector<16x512xf32>
    %38 = arith.addf %37, %4 : vector<16x512xf32>
    %c0_25 = arith.constant 0 : index
    %c0_26 = arith.constant 0 : index
    %39 = vector.load %arg8[%c0_25, %c0_26] : memref<16x512xf32, #tpu.memory_space<vmem>>, vector<16x512xf32>
    tpu.vector_store %arg8[%c0_25, %c0_26], %31 {strides = array<i32>} : memref<16x512xf32, #tpu.memory_space<vmem>>, vector<16x512xf32>,
    %c0_27 = arith.constant 0 : index
    %c0_28 = arith.constant 0 : index
    %40 = vector.load %arg9[%c0_27, %c0_28] : memref<16x512xf32, #tpu.memory_space<vmem>>, vector<16x512xf32>
    tpu.vector_store %arg9[%c0_27, %c0_28], %15 {strides = array<i32>} : memref<16x512xf32, #tpu.memory_space<vmem>>, vector<16x512xf32>,
    %c0_29 = arith.constant 0 : index
    %c0_30 = arith.constant 0 : index
    %41 = vector.load %arg10[%c0_29, %c0_30] : memref<16x512xf32, #tpu.memory_space<vmem>>, vector<16x512xf32>
    tpu.vector_store %arg10[%c0_29, %c0_30], %27 {strides = array<i32>} : memref<16x512xf32, #tpu.memory_space<vmem>>, vector<16x512xf32>,
    %c0_31 = arith.constant 0 : index
    %c0_32 = arith.constant 0 : index
    %42 = vector.load %arg11[%c0_31, %c0_32] : memref<16x512xf32, #tpu.memory_space<vmem>>, vector<16x512xf32>
    tpu.vector_store %arg11[%c0_31, %c0_32], %36 {strides = array<i32>} : memref<16x512xf32, #tpu.memory_space<vmem>>, vector<16x512xf32>,
    %c0_33 = arith.constant 0 : index
    %c0_34 = arith.constant 0 : index
    %43 = vector.load %arg12[%c0_33, %c0_34] : memref<16x512xf32, #tpu.memory_space<vmem>>, vector<16x512xf32>
    tpu.vector_store %arg12[%c0_33, %c0_34], %38 {strides = array<i32>} : memref<16x512xf32, #tpu.memory_space<vmem>>, vector<16x512xf32>,
    %44 = arith.extui %25 : vector<16x512xi1> to vector<16x512xi32>
    %45 = arith.sitofp %44 : vector<16x512xi32> to vector<16x512xf32>
    %46 = arith.truncf %45 : vector<16x512xf32> to vector<16x512xbf16>
    %c0_35 = arith.constant 0 : index
    %c0_36 = arith.constant 0 : index
    %c0_37 = arith.constant 0 : index
    %47 = vector.load %arg13[%c0_35, %c0_36, %c0_37] : memref<1x16x512xbf16, #tpu.memory_space<vmem>>, vector<1x16x512xbf16>
    %48 = vector.shape_cast %47 : vector<1x16x512xbf16> to vector<16x512xbf16>
    %49 = vector.shape_cast %46 : vector<16x512xbf16> to vector<1x16x512xbf16>
    tpu.vector_store %arg13[%c0_35, %c0_36, %c0_37], %49 {strides = array<i32>} : memref<1x16x512xbf16, #tpu.memory_space<vmem>>, vector<1x16x512xbf16>,
    return
  }
  func.func @transform_0(%arg0: i32, %arg1: i32) -> (i32, i32, i32) {
    %c0_i32 = arith.constant 0 : i32
    %c0_i32_0 = arith.constant 0 : i32
    return %arg1, %arg0, %c0_i32 : i32, i32, i32
  }
  func.func @transform_1(%arg0: i32, %arg1: i32) -> (i32, i32) {
    %c0_i32 = arith.constant 0 : i32
    %c0_i32_0 = arith.constant 0 : i32
    return %arg0, %c0_i32 : i32, i32
  }
  func.func @transform_2(%arg0: i32, %arg1: i32) -> (i32, i32) {
    %c0_i32 = arith.constant 0 : i32
    %c0_i32_0 = arith.constant 0 : i32
    return %arg0, %c0_i32 : i32, i32
  }
  func.func @transform_3(%arg0: i32, %arg1: i32) -> (i32, i32) {
    %c0_i32 = arith.constant 0 : i32
    %c0_i32_0 = arith.constant 0 : i32
    return %arg0, %c0_i32 : i32, i32
  }
  func.func @transform_4(%arg0: i32, %arg1: i32) -> (i32, i32) {
    %c0_i32 = arith.constant 0 : i32
    %c0_i32_0 = arith.constant 0 : i32
    return %arg0, %c0_i32 : i32, i32
  }
  func.func @transform_5(%arg0: i32, %arg1: i32) -> (i32, i32) {
    %c0_i32 = arith.constant 0 : i32
    %c0_i32_0 = arith.constant 0 : i32
    return %arg0, %c0_i32 : i32, i32
  }
  func.func @transform_6(%arg0: i32, %arg1: i32) -> (i32, i32) {
    %c0_i32 = arith.constant 0 : i32
    %c0_i32_0 = arith.constant 0 : i32
    return %arg0, %c0_i32 : i32, i32
  }
  func.func @transform_7(%arg0: i32, %arg1: i32) -> (i32, i32) {
    %c0_i32 = arith.constant 0 : i32
    %c0_i32_0 = arith.constant 0 : i32
    return %arg0, %c0_i32 : i32, i32
  }
  func.func @transform_8(%arg0: i32, %arg1: i32) -> (i32, i32) {
    %c0_i32 = arith.constant 0 : i32
    %c0_i32_0 = arith.constant 0 : i32
    return %arg0, %c0_i32 : i32, i32
  }
  func.func @transform_9(%arg0: i32, %arg1: i32) -> (i32, i32) {
    %c0_i32 = arith.constant 0 : i32
    %c0_i32_0 = arith.constant 0 : i32
    return %arg0, %c0_i32 : i32, i32
  }
  func.func @transform_10(%arg0: i32, %arg1: i32) -> (i32, i32) {
    %c0_i32 = arith.constant 0 : i32
    %c0_i32_0 = arith.constant 0 : i32
    return %arg0, %c0_i32 : i32, i32
  }
  func.func @transform_11(%arg0: i32, %arg1: i32) -> (i32, i32, i32) {
    %c0_i32 = arith.constant 0 : i32
    %c0_i32_0 = arith.constant 0 : i32
    return %arg1, %arg0, %c0_i32 : i32, i32, i32
  }
}

</mosaic_0001>

<bundles_post_ra>
// kernel: tpu_custom_call.1
= control target key start
LH: loop header
LB: loop body
LE: loop exit
PB: predicated region body
PF: predicated region fallthrough
CT: control target
= control target key end

     0   :  { %s2479_s0 = inlined_call_operand.vmem [shape: f32[8,16,512], index: 0, kind: input, shape index: {}]   ;;  %s2480_s1 = inlined_call_operand.hbm [shape: f32[16,512], index: 1, kind: input, shape index: {}, may-alias: {1,6}]   ;;  %s2481_s2 = inlined_call_operand.hbm [shape: f32[16,512], index: 2, kind: input, shape index: {}, may-alias: {2,7}]   ;;  %s2482_s3 = inlined_call_operand.hbm [shape: f32[16,512], index: 3, kind: input, shape index: {}, may-alias: {3,8}]   ;;  %s2483_s4 = inlined_call_operand.hbm [shape: f32[16,512], index: 4, kind: input, shape index: {}, may-alias: {4,9}]   ;;  %s2484_s5 = inlined_call_operand.hbm [shape: f32[16,512], index: 5, kind: input, shape index: {}, may-alias: {5,10}]   ;;  %s2485_s6 = inlined_call_operand.hbm [shape: f32[16,512], index: 6, kind: output, shape index: {0}, may-alias: {1,6}]   ;;  %s2486_s7 = inlined_call_operand.hbm [shape: f32[16,512], index: 7, kind: output, shape index: {1}, may-alias: {2,7}]   ;;  %s2487_s8 = inlined_call_operand.hbm [shape: f32[16,512], index: 8, kind: output, shape index: {2}, may-alias: {3,8}]   ;;  %s2488_s9 = inlined_call_operand.hbm [shape: f32[16,512], index: 9, kind: output, shape index: {3}, may-alias: {4,9}]   ;;  %s2489_s10 = inlined_call_operand.hbm [shape: f32[16,512], index: 10, kind: output, shape index: {4}, may-alias: {5,10}]   ;;  %s2490_s11 = inlined_call_operand.hbm [shape: bf16[8,16,512], index: 11, kind: output, shape index: {5}]  }
   0x1   :  { %2508 = sst [smem:[#allocation35_spill]] %s2481_s2 }
   0x2   :  { %2509 = sst [smem:[#allocation36_spill]] %s2489_s10 }
   0x3   :  { %2510 = sst [smem:[#allocation37_spill]] %s2490_s11 }
   0x4   :  { %17 = vsyncpa [#allocation3], 0 }
   0x5   :  { %18 = vsyncpa [#allocation6], 0 }
   0x6   :  { %19 = vsyncpa [#allocation9], 0 }
   0x7   :  { %20 = vsyncpa [#allocation4], 0 }
   0x8   :  { %21 = vsyncpa [#allocation13], 0 }
   0x9   :  { %22 = vsyncpa [#allocation16], 0 }
   0xa   :  { %23 = vsyncpa [#allocation19], 0 }
   0xb   :  { %25 = vsyncpa [#allocation19 + $0x1], 0  ;;  %s1882_s17 = smov 0   ;;  %s1884_s18 = smov 0  }
   0xc   :  { %s1886_s19 = smov 0   ;;  %s1888_s20 = smov 0  }
   0xd   :  { %s1890_s21 = smov 0   ;;  %s1892_s22 = smov 0  }
   0xe LB: > { %2511 = sst [smem:[#allocation27_spill]] %s1782_s17  ;;  %s1214_s23 = sadd.s32 4294967295, %s1802_s22   ;;  %s1802_s22 = sphi %s1892_s22, %s31_s22   ;;  %s1798_s21 = sphi %s1890_s21, %s2541_s21   ;;  %s1794_s20 = sphi %s1888_s20, %s2540_s20   ;;  %s1790_s19 = sphi %s1886_s19, %s2539_s19   ;;  %s1786_s18 = sphi %s1884_s18, %s2543_s18   ;;  %s1782_s17 = sphi %s1882_s17, %s2542_s17  }
   0xf   : > { %2512 = sst [smem:[#allocation28_spill]] %s1790_s19  ;;  %s1215_s24 = sadd.s32 4294967294, %s1802_s22  }
  0x10   : > { %2513 = sst [smem:[#allocation29_spill]] %s1798_s21  ;;  %s40_s25 = sadd.s32 1, %s1798_s21 }
  0x11   : > { %2514 = sst [smem:[#allocation30_spill]] %s1802_s22  ;;  %s340_s26 = sadd.s32 1, %s1790_s19 }
  0x12   : > { %p41_p0 = scmp.ge.s32.totalorder %s40_s25, 8  ;;  %p350_p1 = scmp.ne.s32.totalorder %s1790_s19, %s1786_s18 }
  0x13   : > { %p1918_p2 = scmp.eq.s32.totalorder %s1214_s23, 7  ;;  %p356_p3 = scmp.ne.s32.totalorder %s1786_s18, %s1782_s17 }
  0x14   : > { %s2545_s25 = smov (%p41_p0, %s40_s25), 0  ;;  %p357_p5 = scmp.eq.s32.totalorder %s1215_s24, 7 }
  0x15   : > { %s2515_s27 = scalar_select %p1918_p2, 1, 0 }
  0x16   : > { %2516 = sst [smem:[#allocation31_spill]] %s2545_s25  ;;  %p1928_p4 = por %p1918_p2, %p350_p1 }
  0x17   : > { %s335_s29 = ssub.s32 %s1798_s21, %s2545_s25  ;;  %p1216_p6 = scmp.ge.s32.totalorder %s1802_s22, 1 }
  0x18   : > { %s2517_s28 = scalar_select %p1928_p4, 1, 0 }
  0x19   : > { %p338_p7 = scmp.eq.s32.totalorder %s335_s29, 0  ;;  %p1935_p8 = por %p357_p5, %p356_p3 }
  0x1a   : > { %2518 = sst [smem:[#allocation32_spill]] %s2517_s28  ;;  %p364_p9 = scmp.lt.s32.totalorder %s1802_s22, 9 }
  0x1b   : > { %s2519_s30 = scalar_select %p1935_p8, 1, 0 }
  0x1c   : > { %s1941_s12 = scalar_select %p338_p7, %s1790_s19, %s340_s26  }
  0x1d   : > { %2520 = sst [smem:[#allocation33_spill]] %s2519_s30  ;;  %p1943_p10 = pnand %p1216_p6, %p364_p9 }
  0x1e   : > { %2521 = sst [smem:[#allocation34_spill]] %s1941_s12  ;;  %p1947_p11 = scmp.eq.s32.totalorder %s1214_s23, 0 }
  0x1f   : > { %s2522_s13 = scalar_select %p1943_p10, 1, 0 }
  0x20   : > { %s2523_s14 = scalar_select %p1947_p11, 1, 0 }
  0x21   : > { %p1324_p12 = pneg %p1943_p10  ;;  %s1804_s15 = smov [#allocation5]  }
  0x22   : > { %s397_s16 = sshll.u32 %s1804_s15, 4  ;;  %s1805_s26 = smov [#allocation8]   ;;  %s398_s16 = int_to_ptr.vmem [resolvable:$true] %s397_s16 }
  0x23   : > { %p1955_p13 = pnand %p1947_p11, %p1324_p12  ;;  %s431_s29 = sshll.u32 %s1805_s26, 4  ;;  %s1959_s29 = int_to_ptr.vmem [resolvable:$true] %s431_s29 }
  0x24   : > { %s2525_s2 = sld [smem:[#allocation35_spill]] }
  0x25   : > { %p1969_p1 = pneg %p1955_p13 }
  0x2a   : > { %s1430_s21 = scalar_lea.hbm %s2525_s2, 1024 }
  0x2b   : > { %p1431_p0 = scmp.ne.s32.totalorder %s2525_s2, %s1430_s21  ;;  %p1437_p6 = scmp.lt.u32.totalorder %s1430_s21, %s2525_s2 }
  0x2d   : > { %p1433_p3 = pnand %p1969_p1, %p1431_p0 }
  0x2f   : > { %p1434_p5 = pneg %p1433_p3 }
  0x31   : > { %p1439_p7 = pnand %p1437_p6, %p1434_p5 }
  0x33   : > { %1442 = shalt.err (!%p1439_p7)
}
  0x34   : > { %s1443_s25 = scalar_lea.vmem %s398_s16, 1024  ;;  %p1451_p4 = scmp.lt.s32.totalorder %s398_s16, %s398_s16 }
  0x35   : > { %p1444_p9 = scmp.ne.s32.totalorder %s398_s16, %s1443_s25  ;;  %p1452_p2 = scmp.lt.s32.totalorder %s1443_s25, %s1443_s25 }
  0x37   : > { %p1446_p12 = pnand %p1444_p9, %p1969_p1  ;;  %p1453_p11 = por %p1452_p2, %p1451_p4 }
  0x39   : > { %p1447_p8 = pneg %p1446_p12 }
  0x3b   : > { %p1454_p10 = pnand %p1453_p11, %p1447_p8 }
  0x3d   : > { %1457 = shalt.err (!%p1454_p10)
}
  0x3e   : > { %s1806_s19 = smov 512   ;;  %s1807_s12 = smov 32  }
  0x3f   : > { %1330 = dma.hbm_to_vmem [thread:$0]  (!%p1955_p13), %s2525_s2, 1024, %s398_s16, [#allocation6], %s1806_s19, %s1806_s19, %s1807_s12  }
  0x40   : > { %s1458_s17 = scalar_lea.hbm %s2483_s4, 1024 }
  0x41   : > { %p1459_p2 = scmp.ne.s32.totalorder %s2483_s4, %s1458_s17  ;;  %p1465_p10 = scmp.lt.u32.totalorder %s1458_s17, %s2483_s4 }
  0x43   : > { %p1461_p4 = pnand %p1459_p2, %p1969_p1 }
  0x45   : > { %p1462_p8 = pneg %p1461_p4 }
  0x47   : > { %p1467_p11 = pnand %p1465_p10, %p1462_p8 }
  0x49   : > { %1470 = shalt.err (!%p1467_p11)
}
  0x4a   : > { %s1471_s16 = scalar_lea.vmem %s1959_s29, 1024  ;;  %p1479_p6 = scmp.lt.s32.totalorder %s1959_s29, %s1959_s29 }
  0x4b   : > { %p1472_p0 = scmp.ne.s32.totalorder %s1959_s29, %s1471_s16  ;;  %p1480_p7 = scmp.lt.s32.totalorder %s1471_s16, %s1471_s16 }
  0x4d   : > { %p1474_p3 = pnand %p1472_p0, %p1969_p1  ;;  %p1481_p9 = por %p1480_p7, %p1479_p6 }
  0x4f   : > { %p1475_p5 = pneg %p1474_p3 }
  0x51   : > { %p1482_p12 = pnand %p1481_p9, %p1475_p5 }
  0x53   : > { %1485 = shalt.err (!%p1482_p12)
}
  0x54   : > { %1336 = dma.hbm_to_vmem [thread:$0]  (!%p1955_p13), %s2483_s4, 1024, %s1959_s29, [#allocation9], %s1806_s19, %s1806_s19, %s1807_s12  }
  0x55   : > { %s1808_s22 = smov [#allocation2]   ;;  %s1809_s21 = smov [#allocation7]  }
  0x56   : > { %s380_s28 = sshll.u32 %s1808_s22, 4  ;;  %s414_s30 = sshll.u32 %s1809_s21, 4  ;;  %s381_s28 = int_to_ptr.vmem [resolvable:$true] %s380_s28  ;;  %s415_s30 = int_to_ptr.vmem [resolvable:$true] %s414_s30 }
  0x57   : > { %s1486_s25 = scalar_lea.hbm %s2480_s1, 1024 }
  0x58   : > { %p1487_p2 = scmp.ne.s32.totalorder %s2480_s1, %s1486_s25  ;;  %p1493_p10 = scmp.lt.u32.totalorder %s1486_s25, %s2480_s1 }
  0x5a   : > { %p1489_p4 = pnand %p1487_p2, %p1969_p1 }
  0x5c   : > { %p1490_p8 = pneg %p1489_p4 }
  0x5e   : > { %p1495_p11 = pnand %p1493_p10, %p1490_p8 }
  0x60   : > { %1498 = shalt.err (!%p1495_p11)
}
  0x61   : > { %s1499_s29 = scalar_lea.vmem %s381_s28, 1024  ;;  %p1507_p6 = scmp.lt.s32.totalorder %s381_s28, %s381_s28 }
  0x62   : > { %p1500_p0 = scmp.ne.s32.totalorder %s381_s28, %s1499_s29  ;;  %p1508_p7 = scmp.lt.s32.totalorder %s1499_s29, %s1499_s29 }
  0x64   : > { %p1502_p3 = pnand %p1500_p0, %p1969_p1  ;;  %p1509_p9 = por %p1508_p7, %p1507_p6 }
  0x66   : > { %p1503_p5 = pneg %p1502_p3 }
  0x68   : > { %p1510_p12 = pnand %p1509_p9, %p1503_p5 }
  0x6a   : > { %1513 = shalt.err (!%p1510_p12)
}
  0x6b   : > { %1327 = dma.hbm_to_vmem [thread:$0]  (!%p1955_p13), %s2480_s1, 1024, %s381_s28, [#allocation3], %s1806_s19, %s1806_s19, %s1807_s12  }
  0x6c   : > { %s1514_s21 = scalar_lea.hbm %s2482_s3, 1024 }
  0x6d   : > { %p1515_p2 = scmp.ne.s32.totalorder %s2482_s3, %s1514_s21  ;;  %p1521_p10 = scmp.lt.u32.totalorder %s1514_s21, %s2482_s3 }
  0x6f   : > { %p1517_p4 = pnand %p1515_p2, %p1969_p1 }
  0x71   : > { %p1518_p8 = pneg %p1517_p4 }
  0x73   : > { %p1523_p11 = pnand %p1521_p10, %p1518_p8 }
  0x75   : > { %1526 = shalt.err (!%p1523_p11)
}
  0x76   : > { %s1527_s10 = scalar_lea.vmem %s415_s30, 1024  ;;  %p1535_p6 = scmp.lt.s32.totalorder %s415_s30, %s415_s30 }
  0x77   : > { %p1528_p0 = scmp.ne.s32.totalorder %s415_s30, %s1527_s10  ;;  %p1536_p7 = scmp.lt.s32.totalorder %s1527_s10, %s1527_s10 }
  0x79   : > { %p1530_p3 = pnand %p1528_p0, %p1969_p1  ;;  %p1537_p9 = por %p1536_p7, %p1535_p6 }
  0x7b   : > { %p1531_p5 = pneg %p1530_p3 }
  0x7d   : > { %p1538_p12 = pnand %p1537_p9, %p1531_p5 }
  0x7f   : > { %1541 = shalt.err (!%p1538_p12)
}
  0x80   : > { %1333 = dma.hbm_to_vmem [thread:$0]  (!%p1955_p13), %s2482_s3, 1024, %s415_s30, [#allocation6], %s1806_s19, %s1806_s19, %s1807_s12  }
  0x81   : > { %s1810_s2 = smov [#allocation10]   ;;  %s1542_s21 = scalar_lea.hbm %s2484_s5, 1024 }
  0x82   : > { %s448_s11 = sshll.u32 %s1810_s2, 4  ;;  %p1543_p2 = scmp.ne.s32.totalorder %s2484_s5, %s1542_s21  ;;  %s449_s11 = int_to_ptr.vmem [resolvable:$true] %s448_s11 }
  0x83   : > { %p1549_p10 = scmp.lt.u32.totalorder %s1542_s21, %s2484_s5 }
  0x84   : > { %p1545_p4 = pnand %p1543_p2, %p1969_p1 }
  0x86   : > { %p1546_p8 = pneg %p1545_p4 }
  0x88   : > { %p1551_p11 = pnand %p1549_p10, %p1546_p8 }
  0x8a   : > { %1554 = shalt.err (!%p1551_p11)
}
  0x8b   : > { %s1555_s30 = scalar_lea.vmem %s449_s11, 1024  ;;  %p1563_p6 = scmp.lt.s32.totalorder %s449_s11, %s449_s11 }
  0x8c   : > { %p1556_p0 = scmp.ne.s32.totalorder %s449_s11, %s1555_s30  ;;  %p1564_p7 = scmp.lt.s32.totalorder %s1555_s30, %s1555_s30 }
  0x8e   : > { %p1558_p3 = pnand %p1556_p0, %p1969_p1  ;;  %p1565_p9 = por %p1564_p7, %p1563_p6 }
  0x90   : > { %p1559_p5 = pneg %p1558_p3 }
  0x92   : > { %p1566_p12 = pnand %p1565_p9, %p1559_p5 }
  0x94   : > { %1569 = shalt.err (!%p1566_p12)
}
  0x95   : > { %1339 = dma.hbm_to_vmem [thread:$0]  (!%p1955_p13), %s2484_s5, 1024, %s449_s11, [#allocation9], %s1806_s19, %s1806_s19, %s1807_s12  }
  0x96   : > { %p2527_p2 = scmp.ne.s32.totalorder %s2522_s13, 0 }
  0x97   : > { %p2528_p1 = scmp.ne.s32.totalorder (!%p2527_p2), %s2523_s14, 0 }
  0x98   : > { %478 = sbr.rel (%p2527_p2) target bundleno = 366 (0x16e), region = 44 }
  0x9f   : > { %1753 = dma.done.wait (%p2528_p1), [#allocation3], 1024  }
  0xa0   : > { %1755 = vsyncadd (%p2528_p1), [#allocation3], 4294966272 }
  0xa1   : > { %1757 = dma.done.wait (%p2528_p1), [#allocation6], 2048  }
  0xa2   : > { %1759 = vsyncadd (%p2528_p1), [#allocation6], 4294965248 }
  0xa3   : > { %1761 = dma.done.wait (%p2528_p1), [#allocation9], 2048  }
  0xa4   : > { %1763 = vsyncadd (%p2528_p1), [#allocation9], 4294965248  ;;  %s536_s13 = sand.u32 1, %s1786_s18   ;;  %p540_p13 = scmp.lt.s32.totalorder %s1794_s20, 7 }
  0xa5   : > { %s1229_s24 = sshll.u32 %s536_s13, 5  ;;  %p1232_p4 = scmp.ne.s32.totalorder %s1794_s20, 0 }
  0xa6   : > { %s541_s15 = scalar_select %p540_p13, %s1794_s20, 7 }
  0xa7   : > { %s2101_s11 = scalar_lea.vmem [#allocation18], %s1229_s24  ;;  %564 = sbr.rel (%p1232_p4) target bundleno = 188 (0xbc), region = 68  ;;  %v565_v0 = vld [vmem:[#allocation2] sm:$0xff] (!%p1232_p4)  ;;  %v566_v1 = vld [vmem:[#allocation2 + $0x8] sm:$0xff] (!%p1232_p4)  ;;  %v567_v2 = vld [vmem:[#allocation2 + $0x10] sm:$0xff] (!%p1232_p4) }
  0xa8   : > { %s1276_s19 = sshll.u32 %s541_s15, 6  ;;  %573 = vst [vmem:[#allocation11] sm:$0xff] (!%p1232_p4), %v565_v0  ;;  %574 = vst [vmem:[#allocation11 + $0x8] sm:$0xff] (!%p1232_p4), %v566_v1  ;;  %v568_v3 = vld [vmem:[#allocation2 + $0x18] sm:$0xff] (!%p1232_p4)  ;;  %v569_v4 = vld [vmem:[#allocation2 + $0x20] sm:$0xff] (!%p1232_p4) }
  0xa9   : > { %s2099_s2 = scalar_lea.vmem %s2479_s0, %s1276_s19  ;;  %575 = vst [vmem:[#allocation11 + $0x10] sm:$0xff] (!%p1232_p4), %v567_v2  ;;  %v570_v5 = vld [vmem:[#allocation2 + $0x28] sm:$0xff] (!%p1232_p4)  ;;  %576 = vst [vmem:[#allocation11 + $0x18] sm:$0xff] (!%p1232_p4), %v568_v3  ;;  %v571_v6 = vld [vmem:[#allocation2 + $0x30] sm:$0xff] (!%p1232_p4) }
  0xaa   : > { %577 = vst [vmem:[#allocation11 + $0x20] sm:$0xff] (!%p1232_p4), %v569_v4  ;;  %578 = vst [vmem:[#allocation11 + $0x28] sm:$0xff] (!%p1232_p4), %v570_v5  ;;  %v572_v7 = vld [vmem:[#allocation2 + $0x38] sm:$0xff] (!%p1232_p4)  ;;  %v581_v8 = vld [vmem:[#allocation5] sm:$0xff] (!%p1232_p4) }
  0xab   : > { %579 = vst [vmem:[#allocation11 + $0x30] sm:$0xff] (!%p1232_p4), %v571_v6  ;;  %580 = vst [vmem:[#allocation11 + $0x38] sm:$0xff] (!%p1232_p4), %v572_v7  ;;  %v582_v9 = vld [vmem:[#allocation5 + $0x8] sm:$0xff] (!%p1232_p4)  ;;  %v583_v10 = vld [vmem:[#allocation5 + $0x10] sm:$0xff] (!%p1232_p4) }
  0xac   : > { %589 = vst [vmem:[#allocation12] sm:$0xff] (!%p1232_p4), %v581_v8  ;;  %v584_v11 = vld [vmem:[#allocation5 + $0x18] sm:$0xff] (!%p1232_p4)  ;;  %590 = vst [vmem:[#allocation12 + $0x8] sm:$0xff] (!%p1232_p4), %v582_v9  ;;  %v585_v12 = vld [vmem:[#allocation5 + $0x20] sm:$0xff] (!%p1232_p4) }
  0xad   : > { %591 = vst [vmem:[#allocation12 + $0x10] sm:$0xff] (!%p1232_p4), %v583_v10  ;;  %592 = vst [vmem:[#allocation12 + $0x18] sm:$0xff] (!%p1232_p4), %v584_v11  ;;  %v586_v13 = vld [vmem:[#allocation5 + $0x28] sm:$0xff] (!%p1232_p4)  ;;  %v587_v14 = vld [vmem:[#allocation5 + $0x30] sm:$0xff] (!%p1232_p4) }
  0xae   : > { %593 = vst [vmem:[#allocation12 + $0x20] sm:$0xff] %v585_v12  ;;  %594 = vst [vmem:[#allocation12 + $0x28] sm:$0xff] %v586_v13  ;;  %v588_v15 = vld [vmem:[#allocation5 + $0x38] sm:$0xff]  ;;  %v597_v16 = vld [vmem:[#allocation7] sm:$0xff] }
  0xaf   : > { %595 = vst [vmem:[#allocation12 + $0x30] sm:$0xff] %v587_v14  ;;  %v598_v17 = vld [vmem:[#allocation7 + $0x8] sm:$0xff]  ;;  %596 = vst [vmem:[#allocation12 + $0x38] sm:$0xff] %v588_v15  ;;  %v599_v18 = vld [vmem:[#allocation7 + $0x10] sm:$0xff] }
  0xb0   : > { %605 = vst [vmem:[#allocation14] sm:$0xff] %v597_v16  ;;  %606 = vst [vmem:[#allocation14 + $0x8] sm:$0xff] %v598_v17  ;;  %v600_v19 = vld [vmem:[#allocation7 + $0x18] sm:$0xff]  ;;  %v601_v20 = vld [vmem:[#allocation7 + $0x20] sm:$0xff] }
  0xb1   : > { %607 = vst [vmem:[#allocation14 + $0x10] sm:$0xff] %v599_v18  ;;  %608 = vst [vmem:[#allocation14 + $0x18] sm:$0xff] %v600_v19  ;;  %v602_v21 = vld [vmem:[#allocation7 + $0x28] sm:$0xff]  ;;  %v603_v22 = vld [vmem:[#allocation7 + $0x30] sm:$0xff] }
  0xb2   : > { %609 = vst [vmem:[#allocation14 + $0x20] sm:$0xff] %v601_v20  ;;  %v604_v23 = vld [vmem:[#allocation7 + $0x38] sm:$0xff]  ;;  %610 = vst [vmem:[#allocation14 + $0x28] sm:$0xff] %v602_v21  ;;  %v613_v24 = vld [vmem:[#allocation8] sm:$0xff] }
  0xb3   : > { %611 = vst [vmem:[#allocation14 + $0x30] sm:$0xff] %v603_v22  ;;  %612 = vst [vmem:[#allocation14 + $0x38] sm:$0xff] %v604_v23  ;;  %v614_v25 = vld [vmem:[#allocation8 + $0x8] sm:$0xff]  ;;  %v615_v26 = vld [vmem:[#allocation8 + $0x10] sm:$0xff] }
  0xb4   : > { %621 = vst [vmem:[#allocation15] sm:$0xff] %v613_v24  ;;  %622 = vst [vmem:[#allocation15 + $0x8] sm:$0xff] %v614_v25  ;;  %v616_v27 = vld [vmem:[#allocation8 + $0x18] sm:$0xff]  ;;  %v617_v28 = vld [vmem:[#allocation8 + $0x20] sm:$0xff] }
  0xb5   : > { %623 = vst [vmem:[#allocation15 + $0x10] sm:$0xff] %v615_v26  ;;  %v618_v29 = vld [vmem:[#allocation8 + $0x28] sm:$0xff]  ;;  %624 = vst [vmem:[#allocation15 + $0x18] sm:$0xff] %v616_v27  ;;  %v619_v30 = vld [vmem:[#allocation8 + $0x30] sm:$0xff] }
  0xb6   : > { %625 = vst [vmem:[#allocation15 + $0x20] sm:$0xff] %v617_v28  ;;  %626 = vst [vmem:[#allocation15 + $0x28] sm:$0xff] %v618_v29  ;;  %v620_v31 = vld [vmem:[#allocation8 + $0x38] sm:$0xff]  ;;  %v629_v32 = vld [vmem:[#allocation10] sm:$0xff] }
  0xb7   : > { %627 = vst [vmem:[#allocation15 + $0x30] sm:$0xff] %v619_v30  ;;  %628 = vst [vmem:[#allocation15 + $0x38] sm:$0xff] %v620_v31  ;;  %v630_v33 = vld [vmem:[#allocation10 + $0x8] sm:$0xff]  ;;  %v631_v34 = vld [vmem:[#allocation10 + $0x10] sm:$0xff] }
  0xb8   : > { %637 = vst [vmem:[#allocation17] sm:$0xff] %v629_v32  ;;  %v632_v35 = vld [vmem:[#allocation10 + $0x18] sm:$0xff]  ;;  %638 = vst [vmem:[#allocation17 + $0x8] sm:$0xff] %v630_v33  ;;  %v633_v36 = vld [vmem:[#allocation10 + $0x20] sm:$0xff] }
  0xb9   : > { %639 = vst [vmem:[#allocation17 + $0x10] sm:$0xff] %v631_v34  ;;  %640 = vst [vmem:[#allocation17 + $0x18] sm:$0xff] %v632_v35  ;;  %v634_v37 = vld [vmem:[#allocation10 + $0x28] sm:$0xff]  ;;  %v635_v38 = vld [vmem:[#allocation10 + $0x30] sm:$0xff] }
  0xba   : > { %641 = vst [vmem:[#allocation17 + $0x20] sm:$0xff] %v633_v36  ;;  %642 = vst [vmem:[#allocation17 + $0x28] sm:$0xff] %v634_v37  ;;  %v636_v39 = vld [vmem:[#allocation10 + $0x38] sm:$0xff] }
  0xbb   : > { %643 = vst [vmem:[#allocation17 + $0x30] sm:$0xff] %v635_v38  ;;  %644 = vst [vmem:[#allocation17 + $0x38] sm:$0xff] %v636_v39 }
  0xbc PF: > { %v2105_v40 = vld [vmem:[%s2099_s2] sm:$0xff]  ;;  %v2110_v48 = vld [vmem:[%s2099_s2 + $0x8] sm:$0xff]  ;;  %v2116_v56 = vld [vmem:[%s2099_s2 + $0x10] sm:$0xff]  ;;  %s1811_s14 = smov [#allocation12]   ;;  %s1812_s22 = smov [#allocation15]  }
  0xbd   : > { %v653_v41 = vld [vmem:[#allocation11] sm:$0xff]  ;;  %v654_v46 = vld [vmem:[#allocation11 + $0x8] sm:$0xff]  ;;  %v711_v61 = vld [vmem:[#allocation14 + $0x10] sm:$0xff]  ;;  %s937_s17 = sshll.u32 %s1811_s14, 4  ;;  %s2209_s21 = sshll.u32 %s1812_s22, 4  ;;  %s2192_s17 = int_to_ptr.vmem [resolvable:$true] %s937_s17  ;;  %s972_s21 = int_to_ptr.vmem [resolvable:$true] %s2209_s21 }
  0xbe   : > { %v1233_v43 = vadd.f32 65.0, %v653_v41  ;;  %v709_v45 = vld [vmem:[#allocation14] sm:$0xff]  ;;  %v1234_v49 = vadd.f32 65.0, %v654_v46  ;;  %v710_v51 = vld [vmem:[#allocation14 + $0x8] sm:$0xff]  ;;  %v655_v57 = vld [vmem:[#allocation11 + $0x10] sm:$0xff]  ;;  %v2124_v7 = vadd.f32 -1.0, %v711_v61  ;;  %p1577_p3 = scmp.lt.s32.totalorder %s2192_s17, %s2192_s17 }
  0xbf   : > { %v2107_v47 = vadd.f32 -1.0, %v709_v45  ;;  %v2113_v55 = vadd.f32 -1.0, %v710_v51  ;;  %v1235_v59 = vadd.f32 65.0, %v655_v57  ;;  %v2122_v1 = vld [vmem:[%s2099_s2 + $0x18] sm:$0xff]  ;;  %v657_v16 = vld [vmem:[#allocation11 + $0x20] sm:$0xff]  ;;  %v658_v24 = vld [vmem:[#allocation11 + $0x28] sm:$0xff] }
  0xc0   : > { %v669_v52 = vmul.f32 0.99004984, %v1233_v43  ;;  %v670_v58 = vmul.f32 0.99004984, %v1234_v49  ;;  %v656_v2 = vld [vmem:[#allocation11 + $0x18] sm:$0xff]  ;;  %vm727_vm2 = vcmp.le.f32.partialorder %v2124_v7, 0.0 }
  0xc1   : > { %v685_v42 = vld [vmem:[#allocation12] sm:$0xff]  ;;  %v686_v50 = vld [vmem:[#allocation12 + $0x8] sm:$0xff]  ;;  %vm725_vm0 = vcmp.le.f32.partialorder %v2107_v47, 0.0  ;;  %vm726_vm1 = vcmp.le.f32.partialorder %v2113_v55, 0.0  ;;  %v671_v5 = vmul.f32 0.99004984, %v1235_v59 }
  0xc2   : > { %v693_v44 = vmul.f32 0.60653067, %v685_v42  ;;  %v694_v54 = vmul.f32 0.60653067, %v686_v50  ;;  %v687_v60 = vld [vmem:[#allocation12 + $0x10] sm:$0xff]  ;;  %v677_v62 = vadd.f32 -65.0, %v669_v52 }
  0xc3   : > { %v688_v3 = vld [vmem:[#allocation12 + $0x18] sm:$0xff]  ;;  %v678_v4 = vadd.f32 -65.0, %v670_v58  ;;  %v695_v6 = vmul.f32 0.60653067, %v687_v60  ;;  %v1236_v10 = vadd.f32 65.0, %v656_v2  ;;  %v679_v14 = vadd.f32 -65.0, %v671_v5 }
  0xc4   : > { %v701_v53 = vadd.f32 %v693_v44, %v2105_v40  ;;  %v702_v0 = vadd.f32 %v694_v54, %v2110_v48  ;;  %v696_v11 = vmul.f32 0.60653067, %v688_v3  ;;  %v712_v12 = vld [vmem:[#allocation14 + $0x18] sm:$0xff]  ;;  %v689_v17 = vld [vmem:[#allocation12 + $0x20] sm:$0xff]  ;;  %v1237_v23 = vadd.f32 65.0, %v657_v16  ;;  %v690_v29 = vld [vmem:[#allocation12 + $0x28] sm:$0xff] }
  0xc5   : > { %v703_v15 = vadd.f32 %v695_v6, %v2116_v56  ;;  %v713_v18 = vld [vmem:[#allocation14 + $0x20] sm:$0xff]  ;;  %v672_v19 = vmul.f32 0.99004984, %v1236_v10  ;;  %v2133_v21 = vadd.f32 -1.0, %v712_v12  ;;  %v697_v26 = vmul.f32 0.60653067, %v689_v17 }
  0xc6   : > { %v733_v63 = vsel %vm725_vm0, %v701_v53, 0.0  ;;  %829 = vst [vmem:[#allocation12] sm:$0xff] %v701_v53  ;;  %v734_v9 = vsel %vm726_vm1, %v702_v0, 0.0  ;;  %830 = vst [vmem:[#allocation12 + $0x8] sm:$0xff] %v702_v0  ;;  %v704_v20 = vadd.f32 %v696_v11, %v2122_v1  ;;  %v2136_v22 = vld [vmem:[%s2099_s2 + $0x20] sm:$0xff]  ;;  %v2138_v27 = vadd.f32 -1.0, %v713_v18 }
  0xc7   : > { %v2126_v8 = vadd.f32 %v733_v63, %v677_v62  ;;  %v2128_v13 = vadd.f32 %v734_v9, %v678_v4  ;;  %v735_v25 = vsel %vm727_vm2, %v703_v15, 0.0  ;;  %831 = vst [vmem:[#allocation12 + $0x10] sm:$0xff] %v703_v15  ;;  %v1238_v28 = vadd.f32 65.0, %v658_v24  ;;  %v2144_v33 = vld [vmem:[%s2099_s2 + $0x28] sm:$0xff]  ;;  %v659_v38 = vld [vmem:[#allocation11 + $0x30] sm:$0xff]  ;;  %v660_v53 = vld [vmem:[#allocation11 + $0x38] sm:$0xff] }
  0xc8   : > { %v2140_v30 = vadd.f32 %v735_v25, %v679_v14  ;;  %v680_v31 = vadd.f32 -65.0, %v672_v19  ;;  %vm728_vm3 = vcmp.le.f32.partialorder %v2133_v21, 0.0  ;;  %832 = vst [vmem:[#allocation12 + $0x18] sm:$0xff] %v704_v20  ;;  %v673_v32 = vmul.f32 0.99004984, %v1237_v23  ;;  %v714_v34 = vld [vmem:[#allocation14 + $0x28] sm:$0xff] }
  0xc9   : > { %v736_v35 = vsel %vm728_vm3, %v704_v20, 0.0  ;;  %v705_v36 = vadd.f32 %v697_v26, %v2136_v22  ;;  %vm729_vm4 = vcmp.le.f32.partialorder %v2138_v27, 0.0  ;;  %v674_v37 = vmul.f32 0.99004984, %v1238_v28  ;;  %v691_v39 = vld [vmem:[#allocation12 + $0x30] sm:$0xff]  ;;  %v2162_v59 = vld [vmem:[%s2099_s2 + $0x38] sm:$0xff] }
  0xca   : > { %v2148_v41 = vadd.f32 %v736_v35, %v680_v31  ;;  %v681_v42 = vadd.f32 -65.0, %v673_v32  ;;  %v698_v43 = vmul.f32 0.60653067, %v690_v29  ;;  %v2150_v44 = vadd.f32 -1.0, %v714_v34  ;;  %v2153_v45 = vld [vmem:[%s2099_s2 + $0x30] sm:$0xff]  ;;  %v692_v60 = vld [vmem:[#allocation12 + $0x38] sm:$0xff] }
  0xcb   : > { %v715_v46 = vld [vmem:[#allocation14 + $0x30] sm:$0xff]  ;;  %v737_v49 = vsel %vm729_vm4, %v705_v36, 0.0  ;;  %833 = vst [vmem:[#allocation12 + $0x20] sm:$0xff] %v705_v36  ;;  %v682_v50 = vadd.f32 -65.0, %v674_v37  ;;  %v1239_v51 = vadd.f32 65.0, %v659_v38  ;;  %v716_v61 = vld [vmem:[#allocation14 + $0x38] sm:$0xff] }
  0xcc   : > { %v699_v52 = vmul.f32 0.60653067, %v691_v39  ;;  %v2155_v54 = vadd.f32 %v737_v49, %v681_v42  ;;  %v706_v57 = vadd.f32 %v698_v43, %v2144_v33  ;;  %vm730_vm5 = vcmp.le.f32.partialorder %v2150_v44, 0.0  ;;  %v781_v3 = vld [vmem:[#allocation15] sm:$0xff]  ;;  %v782_v6 = vld [vmem:[#allocation15 + $0x8] sm:$0xff]  ;;  %v783_v14 = vld [vmem:[#allocation15 + $0x10] sm:$0xff] }
  0xcd   : > { %v2159_v58 = vadd.f32 -1.0, %v715_v46  ;;  %v675_v62 = vmul.f32 0.99004984, %v1239_v51  ;;  %v1240_v0 = vadd.f32 65.0, %v660_v53  ;;  %v700_v2 = vmul.f32 0.60653067, %v692_v60 }
  0xce   : > { %v707_v63 = vadd.f32 %v699_v52, %v2153_v45  ;;  %v738_v4 = vsel %vm730_vm5, %v706_v57, 0.0  ;;  %834 = vst [vmem:[#allocation12 + $0x28] sm:$0xff] %v706_v57  ;;  %v2166_v5 = vadd.f32 -1.0, %v716_v61  ;;  %vm749_vm7 = vcmp.ge.f32.partialorder %v2126_v8, -52.0  ;;  %v784_v17 = vld [vmem:[#allocation15 + $0x18] sm:$0xff]  ;;  %v785_v23 = vld [vmem:[#allocation15 + $0x20] sm:$0xff] }
  0xcf   : > { %vm731_vm6 = vcmp.le.f32.partialorder %v2159_v58, 0.0  ;;  %v2169_v9 = vadd.f32 %v738_v4, %v682_v50  ;;  %v683_v10 = vadd.f32 -65.0, %v675_v62  ;;  %v676_v12 = vmul.f32 0.99004984, %v1240_v0  ;;  %v786_v24 = vld [vmem:[#allocation15 + $0x28] sm:$0xff]  ;;  %v787_v29 = vld [vmem:[#allocation15 + $0x30] sm:$0xff] }
  0xd0   : > { %v739_v11 = vsel %vm731_vm6, %v707_v63, 0.0  ;;  %835 = vst [vmem:[#allocation12 + $0x30] sm:$0xff] %v707_v63  ;;  %v708_v15 = vadd.f32 %v700_v2, %v2162_v59  ;;  %vm732_vm8 = vcmp.le.f32.partialorder %v2166_v5, 0.0  ;;  %v789_v16 = vmul.f32 0.95122945, %v781_v3  ;;  %v788_v35 = vld [vmem:[#allocation15 + $0x38] sm:$0xff] }
  0xd1   : > { %vm750_vm9 = vcmp.ge.f32.partialorder %v2128_v13, -52.0  ;;  %v2174_v18 = vadd.f32 %v739_v11, %v683_v10  ;;  %v684_v19 = vadd.f32 -65.0, %v676_v12  ;;  %v790_v20 = vmul.f32 0.95122945, %v782_v6  ;;  %v2216_v0 = vld [vmem:[#allocation17] sm:$0xff]  ;;  %v2218_v2 = vld [vmem:[#allocation17 + $0x8] sm:$0xff] }
  0xd2   : > { %vm751_vm10 = vcmp.ge.f32.partialorder %v2140_v30, -52.0  ;;  %v740_v25 = vsel %vm732_vm8, %v708_v15, 0.0  ;;  %836 = vst [vmem:[#allocation12 + $0x38] sm:$0xff] %v708_v15  ;;  %v797_v26 = vsel %vm749_vm7, 1.0, %v789_v16  ;;  %v791_v28 = vmul.f32 0.95122945, %v783_v14 }
  0xd3   : > { %vm752_vm11 = vcmp.ge.f32.partialorder %v2148_v41, -52.0  ;;  %v2180_v31 = vadd.f32 %v740_v25, %v684_v19  ;;  %845 = vst [vmem:[#allocation15] sm:$0xff] %v797_v26  ;;  %v798_v32 = vsel %vm750_vm9, 1.0, %v790_v20  ;;  %v792_v34 = vmul.f32 0.95122945, %v784_v17  ;;  %v2220_v3 = vld [vmem:[#allocation17 + $0x10] sm:$0xff] }
  0xd4   : > { %vm753_vm12 = vcmp.ge.f32.partialorder %v2155_v54, -52.0  ;;  %846 = vst [vmem:[#allocation15 + $0x8] sm:$0xff] %v798_v32  ;;  %v799_v36 = vsel %vm751_vm10, 1.0, %v791_v28  ;;  %v793_v37 = vmul.f32 0.95122945, %v785_v23  ;;  %vm754_vm13 = vcmp.ge.f32.partialorder %v2169_v9, -52.0 }
  0xd5   : > { %v794_v38 = vmul.f32 0.95122945, %v786_v24  ;;  %847 = vst [vmem:[#allocation15 + $0x10] sm:$0xff] %v799_v36  ;;  %v800_v39 = vsel %vm752_vm11, 1.0, %v792_v34  ;;  %vm755_vm14 = vcmp.ge.f32.partialorder %v2174_v18, -52.0  ;;  %vm756_vm15 = vcmp.ge.f32.partialorder %v2180_v31, -52.0 }
  0xd6   : > { %v795_v42 = vmul.f32 0.95122945, %v787_v29  ;;  %848 = vst [vmem:[#allocation15 + $0x18] sm:$0xff] %v800_v39  ;;  %v801_v43 = vsel %vm753_vm12, 1.0, %v793_v37  ;;  %v796_v49 = vmul.f32 0.95122945, %v788_v35 }
  0xd7   : > { %v802_v46 = vsel %vm754_vm13, 1.0, %v794_v38  ;;  %v765_v50 = vsel %vm749_vm7, -65.0, %v2126_v8  ;;  %849 = vst [vmem:[#allocation15 + $0x20] sm:$0xff] %v801_v43  ;;  %v766_v53 = vsel %vm750_vm9, -65.0, %v2128_v13  ;;  %v767_v57 = vsel %vm751_vm10, -65.0, %v2140_v30  ;;  %s1570_s23 = scalar_lea.vmem %s2192_s17, 1024 }
  0xd8   : > { %850 = vst [vmem:[#allocation15 + $0x28] sm:$0xff] %v802_v46  ;;  %v803_v51 = vsel %vm755_vm14, 1.0, %v795_v42  ;;  %v773_v52 = vmax.f32 %v765_v50, -70.0  ;;  %v804_v60 = vsel %vm756_vm15, 1.0, %v796_v49  ;;  %v774_v61 = vmax.f32 %v766_v53, -70.0  ;;  %p1571_p8 = scmp.ne.s32.totalorder %s2192_s17, %s1570_s23  ;;  %p2529_p10 = scmp.ne.s32.totalorder %s2515_s27, 0 }
  0xd9   : > { %851 = vst [vmem:[#allocation15 + $0x30] sm:$0xff] %v803_v51  ;;  %v775_v62 = vmax.f32 %v767_v57, -70.0  ;;  %v768_v63 = vsel %vm752_vm11, -65.0, %v2148_v41  ;;  %p1578_p5 = scmp.lt.s32.totalorder %s1570_s23, %s1570_s23 }
  0xda   : > { %p1572_p11 = pnand %p1571_p8, %p2529_p10 }
  0xdb   : > { %p1579_p6 = por %p1578_p5, %p1577_p3 }
  0xdc   : > { %p1573_p0 = pneg %p1572_p11 }
  0xde   : > { %p1580_p7 = pnand %p1579_p6, %p1573_p0 }
  0xe0   : > { %1583 = shalt.err (!%p1580_p7)
}
  0xe1   : > { %s1584_s16 = scalar_lea.hbm %s2486_s7, 1024 }
  0xe2   : > { %p1585_p9 = scmp.ne.s32.totalorder %s2486_s7, %s1584_s16  ;;  %p1590_p1 = scmp.lt.u32.totalorder %s1584_s16, %s2486_s7 }
  0xe4   : > { %p1586_p12 = pnand %p1585_p9, %p2529_p10 }
  0xe6   : > { %p1587_p2 = pneg %p1586_p12 }
  0xe8   : > { %p1592_p13 = pnand %p1590_p1, %p1587_p2 }
  0xea   : > { %1595 = shalt.err (!%p1592_p13)
}
  0xeb   : > { %s1813_s15 = smov 512   ;;  %s1814_s19 = smov 32   ;;  %852 = vst [vmem:[#allocation15 + $0x38] sm:$0xff] %v804_v60  ;;  %821 = vst [vmem:[#allocation11] sm:$0xff] %v773_v52  ;;  %v776_v4 = vmax.f32 %v768_v63, -70.0  ;;  %v769_v6 = vsel %vm753_vm12, -65.0, %v2155_v54 }
  0xec   : > { %1305 = dma.vmem_to_hbm [thread:$0]  (%p2529_p10), %s2192_s17, 1024, %s2486_s7, [#allocation13], %s1813_s15, %s1813_s15, %s1814_s19   ;;  %v770_v10 = vsel %vm754_vm13, -65.0, %v2169_v9  ;;  %v771_v11 = vsel %vm755_vm14, -65.0, %v2174_v18  ;;  %v808_v12 = vld [vmem:[#allocation17 + $0x18] sm:$0xff]  ;;  %v809_v14 = vld [vmem:[#allocation17 + $0x20] sm:$0xff] }
  0xed   : > { %v810_v15 = vld [vmem:[#allocation17 + $0x28] sm:$0xff]  ;;  %v811_v16 = vld [vmem:[#allocation17 + $0x30] sm:$0xff]  ;;  %822 = vst [vmem:[#allocation11 + $0x8] sm:$0xff] %v774_v61  ;;  %823 = vst [vmem:[#allocation11 + $0x10] sm:$0xff] %v775_v62  ;;  %v777_v17 = vmax.f32 %v769_v6, -70.0  ;;  %v778_v19 = vmax.f32 %v770_v10, -70.0  ;;  %p1603_p0 = scmp.lt.s32.totalorder %s972_s21, %s972_s21 }
  0xee   : > { %v779_v20 = vmax.f32 %v771_v11, -70.0  ;;  %v772_v23 = vsel %vm756_vm15, -65.0, %v2180_v31  ;;  %v2261_v24 = vld [vmem:[#allocation17 + $0x38] sm:$0xff]  ;;  %s1596_s2 = scalar_lea.vmem %s972_s21, 1024 }
  0xef   : > { %p1597_p4 = scmp.ne.s32.totalorder %s972_s21, %s1596_s2  ;;  %p1604_p3 = scmp.lt.s32.totalorder %s1596_s2, %s1596_s2 }
  0xf1   : > { %p1598_p8 = pnand %p1597_p4, %p2529_p10  ;;  %p1605_p5 = por %p1604_p3, %p1603_p0 }
  0xf3   : > { %p1599_p11 = pneg %p1598_p8 }
  0xf5   : > { %p1606_p6 = pnand %p1605_p5, %p1599_p11 }
  0xf7   : > { %1609 = shalt.err (!%p1606_p6)
}
  0xf8   : > { %s1610_s22 = scalar_lea.hbm %s2488_s9, 1024 }
  0xf9   : > { %p1611_p7 = scmp.ne.s32.totalorder %s2488_s9, %s1610_s22  ;;  %p1616_p2 = scmp.lt.u32.totalorder %s1610_s22, %s2488_s9 }
  0xfb   : > { %p1612_p9 = pnand %p1611_p7, %p2529_p10 }
  0xfd   : > { %p1613_p12 = pneg %p1612_p9 }
  0xff   : > { %p1618_p1 = pnand %p1616_p2, %p1613_p12 }
 0x101   : > { %1621 = shalt.err (!%p1618_p1)
}
 0x102   : > { %1309 = dma.vmem_to_hbm [thread:$0]  (%p2529_p10), %s972_s21, 1024, %s2488_s9, [#allocation16], %s1813_s15, %s1813_s15, %s1814_s19   ;;  %824 = vst [vmem:[#allocation11 + $0x18] sm:$0xff] %v776_v4  ;;  %v780_v25 = vmax.f32 %v772_v23, -70.0  ;;  %v757_v26 = vsel %vm749_vm7, 5.0, %v2107_v47  ;;  %v758_v28 = vsel %vm750_vm9, 5.0, %v2113_v55  ;;  %v816_v34 = vadd.f32 %v808_v12, %v2122_v1 }
 0x103   : > { %v759_v29 = vsel %vm751_vm10, 5.0, %v2124_v7  ;;  %825 = vst [vmem:[#allocation11 + $0x20] sm:$0xff] %v777_v17  ;;  %826 = vst [vmem:[#allocation11 + $0x28] sm:$0xff] %v778_v19  ;;  %v760_v32 = vsel %vm752_vm11, 5.0, %v2133_v21  ;;  %v761_v47 = vsel %vm753_vm12, 5.0, %v2138_v27  ;;  %v762_v55 = vsel %vm754_vm13, 5.0, %v2150_v44 }
 0x104   : > { %827 = vst [vmem:[#allocation11 + $0x30] sm:$0xff] %v779_v20  ;;  %837 = vst [vmem:[#allocation14] sm:$0xff] %v757_v26  ;;  %v763_v7 = vsel %vm755_vm14, 5.0, %v2159_v58  ;;  %s1815_s21 = smov [#allocation11]   ;;  %s1816_s24 = smov [#allocation14]   ;;  %v764_v21 = vsel %vm756_vm15, 5.0, %v2166_v5  ;;  %v813_v27 = vadd.f32 %v2216_v0, %v2105_v40  ;;  %v814_v44 = vadd.f32 %v2218_v2, %v2110_v48 }
 0x105   : > { %838 = vst [vmem:[#allocation14 + $0x8] sm:$0xff] %v758_v28  ;;  %839 = vst [vmem:[#allocation14 + $0x10] sm:$0xff] %v759_v29  ;;  %s920_s28 = sshll.u32 %s1815_s21, 4  ;;  %s954_s12 = sshll.u32 %s1816_s24, 4  ;;  %v815_v58 = vadd.f32 %v2220_v3, %v2116_v56  ;;  %v817_v35 = vadd.f32 %v809_v14, %v2136_v22  ;;  %v818_v36 = vadd.f32 %v810_v15, %v2144_v33  ;;  %s921_s28 = int_to_ptr.vmem [resolvable:$true] %s920_s28  ;;  %s2314_s12 = int_to_ptr.vmem [resolvable:$true] %s954_s12 }
 0x106   : > { %828 = vst [vmem:[#allocation11 + $0x38] sm:$0xff] %v780_v25  ;;  %840 = vst [vmem:[#allocation14 + $0x18] sm:$0xff] %v760_v32  ;;  %v819_v5 = vadd.f32 %v811_v16, %v2153_v45  ;;  %s1622_s29 = scalar_lea.vmem %s921_s28, 1024  ;;  %p1629_p11 = scmp.lt.s32.totalorder %s921_s28, %s921_s28 }
 0x107   : > { %841 = vst [vmem:[#allocation14 + $0x20] sm:$0xff] %v761_v47  ;;  %842 = vst [vmem:[#allocation14 + $0x28] sm:$0xff] %v762_v55  ;;  %p1623_p13 = scmp.ne.s32.totalorder %s921_s28, %s1622_s29  ;;  %p1630_p0 = scmp.lt.s32.totalorder %s1622_s29, %s1622_s29 }
 0x108   : > { %843 = vst [vmem:[#allocation14 + $0x30] sm:$0xff] %v763_v7  ;;  %844 = vst [vmem:[#allocation14 + $0x38] sm:$0xff] %v764_v21 }
 0x109   : > { %p1624_p4 = pnand %p1623_p13, %p2529_p10  ;;  %p1631_p3 = por %p1630_p0, %p1629_p11 }
 0x10b   : > { %p1625_p8 = pneg %p1624_p4 }
 0x10d   : > { %p1632_p5 = pnand %p1631_p3, %p1625_p8 }
 0x10f   : > { %1635 = shalt.err (!%p1632_p5)
}
 0x110   : > { %s1636_s17 = scalar_lea.hbm %s2485_s6, 1024 }
 0x111   : > { %p1637_p6 = scmp.ne.s32.totalorder %s2485_s6, %s1636_s17  ;;  %p1642_p12 = scmp.lt.u32.totalorder %s1636_s17, %s2485_s6 }
 0x113   : > { %p1638_p7 = pnand %p1637_p6, %p2529_p10 }
 0x115   : > { %p1639_p9 = pneg %p1638_p7 }
 0x117   : > { %p1644_p2 = pnand %p1642_p12, %p1639_p9 }
 0x119   : > { %1647 = shalt.err (!%p1644_p2)
}
 0x11a   : > { %1303 = dma.vmem_to_hbm [thread:$0]  (%p2529_p10), %s921_s28, 1024, %s2485_s6, [#allocation4], %s1813_s15, %s1813_s15, %s1814_s19   ;;  %853 = vst [vmem:[#allocation17] sm:$0xff] %v813_v27  ;;  %854 = vst [vmem:[#allocation17 + $0x8] sm:$0xff] %v814_v44  ;;  %v820_v40 = vadd.f32 %v2261_v24, %v2162_v59  ;;  %v1817_v48 = vmov 0.0  }
 0x11b   : > { %855 = vst [vmem:[#allocation17 + $0x10] sm:$0xff] %v815_v58  ;;  %v1249_v56 = vsel %vm749_vm7, 1.0, %v1817_v48  ;;  %v1250_v1 = vsel %vm750_vm9, 1.0, %v1817_v48  ;;  %v1251_v22 = vsel %vm751_vm10, 1.0, %v1817_v48  ;;  %s1648_s10 = scalar_lea.vmem %s2314_s12, 1024  ;;  %p1655_p8 = scmp.lt.s32.totalorder %s2314_s12, %s2314_s12 }
 0x11c   : > { %p1649_p1 = scmp.ne.s32.totalorder %s2314_s12, %s1648_s10  ;;  %p1656_p11 = scmp.lt.s32.totalorder %s1648_s10, %s1648_s10 }
 0x11e   : > { %p1650_p13 = pnand %p1649_p1, %p2529_p10  ;;  %p1657_p0 = por %p1656_p11, %p1655_p8 }
 0x120   : > { %p1651_p4 = pneg %p1650_p13 }
 0x122   : > { %p1658_p3 = pnand %p1657_p0, %p1651_p4 }
 0x124   : > { %1661 = shalt.err (!%p1658_p3)
}
 0x125   : > { %s1662_s24 = scalar_lea.hbm %s2487_s8, 1024 }
 0x126   : > { %p1663_p5 = scmp.ne.s32.totalorder %s2487_s8, %s1662_s24  ;;  %p1668_p9 = scmp.lt.u32.totalorder %s1662_s24, %s2487_s8 }
 0x128   : > { %p1664_p6 = pnand %p1663_p5, %p2529_p10 }
 0x12a   : > { %p1665_p7 = pneg %p1664_p6 }
 0x12c   : > { %p1670_p12 = pnand %p1668_p9, %p1665_p7 }
 0x12e   : > { %1673 = shalt.err (!%p1670_p12)
}
 0x12f   : > { %1307 = dma.vmem_to_hbm [thread:$0]  (%p2529_p10), %s2314_s12, 1024, %s2487_s8, [#allocation13], %s1813_s15, %s1813_s15, %s1814_s19   ;;  %856 = vst [vmem:[#allocation17 + $0x18] sm:$0xff] %v816_v34  ;;  %857 = vst [vmem:[#allocation17 + $0x20] sm:$0xff] %v817_v35  ;;  %v1277_v8 = vpack.c.bf16 %v1250_v1, %v1249_v56  ;;  %v1252_v13 = vsel %vm752_vm11, 1.0, %v1817_v48  ;;  %v1253_v30 = vsel %vm753_vm12, 1.0, %v1817_v48 }
 0x130   : > { %858 = vst [vmem:[#allocation17 + $0x28] sm:$0xff] %v818_v36  ;;  %859 = vst [vmem:[#allocation17 + $0x30] sm:$0xff] %v819_v5  ;;  %v1254_v33 = vsel %vm754_vm13, 1.0, %v1817_v48  ;;  %v1278_v45 = vpack.c.bf16 %v1252_v13, %v1251_v22  ;;  %v1255_v37 = vsel %vm755_vm14, 1.0, %v1817_v48  ;;  %v1256_v38 = vsel %vm756_vm15, 1.0, %v1817_v48  ;;  %s1818_s12 = smov [#allocation17]  }
 0x131   : > { %860 = vst [vmem:[#allocation17 + $0x38] sm:$0xff] %v820_v40  ;;  %v1279_v59 = vpack.c.bf16 %v1254_v33, %v1253_v30  ;;  %s988_s26 = sshll.u32 %s1818_s12, 4  ;;  %s1281_s25 = sshll.u32 %s1794_s20, 9  ;;  %901 = vst [vmem:[%s2101_s11] sm:$0xff] %v1277_v8  ;;  %v1280_v41 = vpack.c.bf16 %v1256_v38, %v1255_v37  ;;  %s989_s26 = int_to_ptr.vmem [resolvable:$true] %s988_s26 }
 0x132   : > { %s2530_s10 = sld [smem:[#allocation37_spill]]  ;;  %902 = vst [vmem:[%s2101_s11 + $0x8] sm:$0xff] %v1278_v45  ;;  %s1674_s28 = scalar_lea.vmem %s989_s26, 1024 }
 0x133   : > { %903 = vst [vmem:[%s2101_s11 + $0x10] sm:$0xff] %v1279_v59  ;;  %p1675_p2 = scmp.ne.s32.totalorder %s989_s26, %s1674_s28  ;;  %p1681_p4 = scmp.lt.s32.totalorder %s989_s26, %s989_s26 }
 0x134   : > { %p1682_p8 = scmp.lt.s32.totalorder %s1674_s28, %s1674_s28 }
 0x135   : > { %p1676_p1 = pnand %p1675_p2, %p2529_p10 }
 0x136   : > { %p1683_p11 = por %p1682_p8, %p1681_p4 }
 0x137   : > { %p1677_p13 = pneg %p1676_p1 }
 0x138   : > { %s2390_s21 = scalar_lea.hbm %s2530_s10, %s1281_s25 }
 0x139   : > { %p1684_p0 = pnand %p1683_p11, %p1677_p13 }
 0x13b   : > { %1687 = shalt.err (!%p1684_p0)
}
 0x13c   : > { %s2531_s29 = sld [smem:[#allocation36_spill]] }
 0x142   : > { %s1688_s2 = scalar_lea.hbm %s2531_s29, 1024 }
 0x143   : > { %p1689_p3 = scmp.ne.s32.totalorder %s2531_s29, %s1688_s2  ;;  %p1694_p7 = scmp.lt.u32.totalorder %s1688_s2, %s2531_s29 }
 0x145   : > { %p1690_p5 = pnand %p1689_p3, %p2529_p10 }
 0x147   : > { %p1691_p6 = pneg %p1690_p5 }
 0x149   : > { %p1696_p9 = pnand %p1694_p7, %p1691_p6 }
 0x14b   : > { %1699 = shalt.err (!%p1696_p9)
}
 0x14c   : > { %s2532_s16 = sld [smem:[#allocation32_spill]]  ;;  %904 = vst [vmem:[%s2101_s11 + $0x18] sm:$0xff] %v1280_v41  ;;  %s1007_s30 = sshll.u32 %s2101_s11, 4  ;;  %s2417_s30 = int_to_ptr.vmem [resolvable:$true] %s1007_s30 }
 0x14d   : > { %1311 = dma.vmem_to_hbm [thread:$0]  (%p2529_p10), %s989_s26, 1024, %s2531_s29, [#allocation16], %s1813_s15, %s1813_s15, %s1814_s19  }
 0x14e   : > { %s2421_s28 = scalar_lea.sflag [#allocation19], %s536_s13  ;;  %s1700_s20 = scalar_lea.vmem %s2417_s30, 512 }
 0x14f   : > { %p1701_p12 = scmp.ne.s32.totalorder %s2417_s30, %s1700_s20  ;;  %s1819_s24 = smov [#allocation18]  }
 0x150   : > { %s1704_s2 = sshll.u32 %s1819_s24, 4  ;;  %s1705_s2 = int_to_ptr.vmem [resolvable:$false] %s1704_s2 }
 0x151   : > { %s1706_s14 = scalar_lea.vmem %s1705_s2, 1024  ;;  %p1707_p4 = scmp.lt.s32.totalorder %s2417_s30, %s1705_s2 }
 0x152   : > { %p2533_p2 = scmp.ne.s32.totalorder %s2532_s16, 0  ;;  %p1708_p8 = scmp.lt.s32.totalorder %s1706_s14, %s1700_s20 }
 0x154   : > { %p1702_p1 = pnand %p1701_p12, %p2533_p2  ;;  %p1709_p11 = por %p1708_p8, %p1707_p4 }
 0x156   : > { %p1703_p13 = pneg %p1702_p1 }
 0x158   : > { %p1710_p0 = pnand %p1709_p11, %p1703_p13 }
 0x15a   : > { %1713 = shalt.err (!%p1710_p0)
}
 0x15b   : > { %s1714_s13 = scalar_lea.hbm %s2390_s21, 512  ;;  %s1718_s19 = scalar_lea.hbm %s2530_s10, 4096 }
 0x15c   : > { %p1715_p3 = scmp.ne.s32.totalorder %s2390_s21, %s1714_s13  ;;  %p1719_p7 = scmp.lt.u32.totalorder %s2390_s21, %s2530_s10 }
 0x15d   : > { %p1720_p9 = scmp.lt.u32.totalorder %s1718_s19, %s1714_s13  ;;  %p1722_p1 = scmp.lt.u32.totalorder %s1714_s13, %s2390_s21 }
 0x15e   : > { %p1716_p5 = pnand %p1715_p3, %p2533_p2 }
 0x15f   : > { %p1721_p12 = por %p1720_p9, %p1719_p7 }
 0x160   : > { %p1717_p6 = pneg %p1716_p5 }
 0x161   : > { %p1723_p13 = por %p1722_p1, %p1721_p12 }
 0x163   : > { %p1724_p4 = pnand %p1723_p13, %p1717_p6 }
 0x165   : > { %1727 = shalt.err (!%p1724_p4)
}
 0x166   : > { %s1820_s22 = smov 256   ;;  %s1821_s23 = smov 16  }
 0x167   : > { %1312 = dma.vmem_to_hbm [thread:$0]  (%p2533_p2), %s2417_s30, 512, %s2390_s21, %s2421_s28, %s1820_s22, %s1820_s22, %s1821_s23  }
 0x168   : > { %1765 = dma.done.wait (%p2529_p10), [#allocation4], 1024  }
 0x169   : > { %1767 = vsyncadd (%p2529_p10), [#allocation4], 4294966272 }
 0x16a   : > { %1769 = dma.done.wait (%p2529_p10), [#allocation13], 2048  }
 0x16b   : > { %1771 = vsyncadd (%p2529_p10), [#allocation13], 4294965248 }
 0x16c   : > { %1773 = dma.done.wait (%p2529_p10), [#allocation16], 2048  }
 0x16d   : > { %1775 = vsyncadd (%p2529_p10), [#allocation16], 4294965248 }
 0x16e PF: > { %s2534_s12 = sld [smem:[#allocation30_spill]]  ;;  %s2535_s21 = sld [smem:[#allocation27_spill]] }
 0x16f   : > { %s2536_s25 = sld [smem:[#allocation33_spill]] }
 0x174   : > { %p1364_p2 = scmp.ge.s32.totalorder %s2534_s12, 2  ;;  %s1042_s16 = sand.u32 1, %s2535_s21  }
 0x175   : > { %p2537_p8 = scmp.ne.s32.totalorder %s2536_s25, 0  ;;  %s1043_s30 = scalar_lea.sflag [#allocation19], %s1042_s16 }
 0x177   : > { %p1341_p11 = pnand %p1364_p2, %p2537_p8 }
 0x179   : > { %1777 = dma.done.wait (!%p1341_p11), %s1043_s30, 512  }
 0x17a   : > { %1779 = vsyncadd (!%p1341_p11), %s1043_s30, 4294966784  ;;  %s31_s22 = sadd.s32 1, %s2534_s12   ;;  %s2538_s28 = sld [smem:[#allocation28_spill]] }
 0x17b   : > { %p28_p0 = scmp.ge.s32.totalorder %s31_s22, 10   ;;  %s2539_s19 = sld [smem:[#allocation34_spill]] }
 0x17c   : > { %s2540_s20 = sld [smem:[#allocation29_spill]]  ;;  %s2541_s21 = sld [smem:[#allocation31_spill]] }
 0x17d   : > { %s2542_s17 = smov %s1786_s18  ;;  %30 = sbr.rel (!%p28_p0) target bundleno = 14 (0xe), region = 155 }
 0x180   : > { %s2543_s18 = smov %s2538_s28 }
 0x184   :  { %1048 = vsyncpa [#allocation3], 1 }
 0x185   :  { %1050 = vsyncpa [#allocation3 + $0x1], 1 }
 0x186   :  { %1051 = vsyncpa [#allocation6], 1 }
 0x187   :  { %1052 = vsyncpa [#allocation9], 1 }
 0x188   :  { %1053 = vsyncpa [#allocation4], 1 }
 0x189   :  { %1055 = vsyncpa [#allocation4 + $0x1], 1 }
 0x18a   :  { %1056 = vsyncpa [#allocation13], 1 }
 0x18b   :  { %1057 = vsyncpa [#allocation16], 1 }
 0x18c   :  { %1058 = vsyncpa [#allocation19], 1 }
 0x18d   :  { %1060 = vsyncpa [#allocation19 + $0x1], 1 }

</bundles_post_ra>
